<compile_context>
chip_gen: v7x
topology: tpu7x:2x2x1
jax: 0.10.0
libtpu: 0.0.40
codegen_flags: <defaults>
</compile_context>

<pallas_src>
import functools

import jax
import jax.numpy as jnp
from jax.experimental import pallas as pl
from jax.experimental.pallas import tpu as pltpu


def _round_up(x: int, m: int) -> int:
    return ((x + m - 1) // m) * m


def _linear_kernel(x_ref, w_ref, b_ref, o_ref):
    # x_ref: (tm, in_f), w_ref: (in_f, out_f) [pre-transposed], b_ref: (1, out_f),
    # o_ref: (tm, out_f). f32 accumulation on the MXU, f32 bias add, cast at store.
    y = jnp.dot(x_ref[...], w_ref[...], preferred_element_type=jnp.float32)
    o_ref[...] = (y + b_ref[...].astype(jnp.float32)).astype(o_ref.dtype)


def _row_tile(batch: int, block_rows: int) -> int:
    # Multiple of 8 sublanes, regardless of what the caller passed.
    tm = max(8, _round_up(min(block_rows, batch), 8))
    # If the whole batch fits in one tile, split it so the grid has >= 2 steps and the
    # "parallel" batch axis can shard across both TensorCores on v7x.
    if batch > 8 and pl.cdiv(batch, tm) < 2:
        tm = max(8, _round_up(pl.cdiv(batch, 2), 8))
    return tm


@functools.partial(jax.jit, static_argnames=("block_rows", "min_pallas_rows"))
def fully_connected(x, weight, bias, *, block_rows=1024, min_pallas_rows=1024):
    """y = x @ weight.T + bias via a batch-tiled Pallas TPU kernel.

    x:      [B, in_features]
    weight: [out_features, in_features]   (PyTorch nn.Linear layout)
    bias:   [out_features]
    returns [B, out_features] in x.dtype
    """
    B, in_f = x.shape
    out_f, in_f_w = weight.shape
    assert in_f == in_f_w, "in_features mismatch"
    out_dtype = x.dtype

    # Pre-transpose weight once (tiny [15, 10] tensor): kernel consumes [in_f, out_f].
    w_t = weight.T
    bias_2d = bias.reshape(1, out_f)

    # Tiny batches: a single fused XLA op beats pallas_call dispatch overhead.
    if B < min_pallas_rows:
        y = jnp.dot(x, w_t, preferred_element_type=jnp.float32) + bias_2d.astype(jnp.float32)
        return y.astype(out_dtype)

    tm = _row_tile(B, block_rows)
    grid = (pl.cdiv(B, tm),)

    return pl.pallas_call(
        _linear_kernel,
        out_shape=jax.ShapeDtypeStruct((B, out_f), out_dtype),
        grid_spec=pltpu.PrefetchScalarGridSpec(
            num_scalar_prefetch=0,
            grid=grid,
            in_specs=[
                # Activations: tiled over batch, feature axis unpadded (== full array dim).
                pl.BlockSpec((tm, in_f), lambda i: (i, 0)),
                # Weight & bias: full-array blocks, VMEM-resident across the whole grid.
                pl.BlockSpec((in_f, out_f), lambda i: (0, 0)),
                pl.BlockSpec((1, out_f), lambda i: (0, 0)),
            ],
            out_specs=pl.BlockSpec((tm, out_f), lambda i: (i, 0)),
        ),
        compiler_params=pltpu.CompilerParams(
            # Batch tiles are independent -> shard across TensorCores (v7x).
            dimension_semantics=("parallel",),
        ),
    )(x, w_t, bias_2d)


def init_linear_params(key, in_features, out_features, dtype=jnp.float32):
    """Deterministic init mimicking nn.Linear default (uniform +-1/sqrt(in))."""
    kw, kb = jax.random.split(key)
    bound = 1.0 / jnp.sqrt(jnp.float32(in_features))
    weight = jax.random.uniform(
        kw, (out_features, in_features), dtype=dtype, minval=-bound, maxval=bound
    )
    bias = jax.random.uniform(
        kb, (out_features,), dtype=dtype, minval=-bound, maxval=bound
    )
    return weight, bias


if __name__ == "__main__":
    in_features, out_features = 15, 10

    key = jax.random.PRNGKey(0)
    k_x1, k_x2, k_p = jax.random.split(key, 3)
    weight, bias = init_linear_params(k_p, in_features, out_features)

    # 1) Spec-consistent small shape (batch=2), forcing the Pallas path so the kernel runs.
    x_small = jax.random.normal(k_x1, (2, in_features), dtype=jnp.float32)
    y_small = fully_connected(x_small, weight, bias, min_pallas_rows=0)
    jax.block_until_ready(y_small)
    y_small_ref = x_small @ weight.T + bias
    assert y_small.shape == (2, out_features)
    assert jnp.allclose(y_small, y_small_ref, atol=1e-5, rtol=1e-5)

    # 2) Multi-tile grid with a ragged last tile (300 rows, tm=128 -> 3 grid steps).
    x_big = jax.random.normal(k_x2, (300, in_features), dtype=jnp.float32)
    y_big = fully_connected(x_big, weight, bias, block_rows=128, min_pallas_rows=0)
    jax.block_until_ready(y_big)
    y_big_ref = x_big @ weight.T + bias
    assert y_big.shape == (300, out_features)
    assert jnp.allclose(y_big, y_big_ref, atol=1e-5, rtol=1e-5)

    print("KERNEL_OK")
</pallas_src>

<mosaic_0001>
module attributes {stable_mosaic.version = 11 : i64} {
  func.func @_linear_kernel(%arg0: i32, %arg1: memref<8x15xf32, #tpu.memory_space<vmem>>, %arg2: memref<15x10xf32, #tpu.memory_space<vmem>>, %arg3: memref<1x10xf32, #tpu.memory_space<vmem>>, %arg4: memref<8x10xf32, #tpu.memory_space<vmem>>) attributes {dimension_semantics = [#tpu.dimension_semantics<parallel>], iteration_bounds = array<i64: 1>, scalar_prefetch = 0 : i64, scratch_operands = 0 : i64, tpu.core_type = #tpu.core_type<tc>, window_params = [{transform_indices = @transform_0, window_bounds = array<i64: 8, 15>}, {pipeline_mode = #tpu.pipeline_mode<synchronous>, transform_indices = @transform_1, window_bounds = array<i64: 15, 10>}, {pipeline_mode = #tpu.pipeline_mode<synchronous>, transform_indices = @transform_2, window_bounds = array<i64: 1, 10>}, {transform_indices = @transform_3, window_bounds = array<i64: 8, 10>}]} {
    %c0 = arith.constant 0 : index
    %c0_0 = arith.constant 0 : index
    %0 = vector.load %arg1[%c0, %c0_0] : memref<8x15xf32, #tpu.memory_space<vmem>>, vector<8x15xf32>
    %c0_1 = arith.constant 0 : index
    %c0_2 = arith.constant 0 : index
    %1 = vector.load %arg2[%c0_1, %c0_2] : memref<15x10xf32, #tpu.memory_space<vmem>>, vector<15x10xf32>
    %cst = arith.constant dense<0.000000e+00> : vector<8x10xf32>
    %2 = tpu.matmul %0, %1, %cst {dimension_numbers = #tpu.dot_dimension_numbers<[1], [0], [0], [1], [0, 0, 1, 1], [], []>} : vector<8x15xf32>, vector<15x10xf32>, vector<8x10xf32> -> vector<8x10xf32>
    %c0_3 = arith.constant 0 : index
    %c0_4 = arith.constant 0 : index
    %3 = vector.load %arg3[%c0_3, %c0_4] : memref<1x10xf32, #tpu.memory_space<vmem>>, vector<1x10xf32>
    %4 = vector.broadcast %3 : vector<1x10xf32> to vector<8x10xf32>
    %5 = arith.addf %2, %4 : vector<8x10xf32>
    %c0_5 = arith.constant 0 : index
    %c0_6 = arith.constant 0 : index
    %6 = vector.load %arg4[%c0_5, %c0_6] : memref<8x10xf32, #tpu.memory_space<vmem>>, vector<8x10xf32>
    tpu.vector_store %arg4[%c0_5, %c0_6], %5 {strides = array<i32>} : memref<8x10xf32, #tpu.memory_space<vmem>>, vector<8x10xf32>,
    return
  }
  func.func @transform_0(%arg0: i32) -> (i32, i32) {
    %c0_i32 = arith.constant 0 : i32
    %c0_i32_0 = arith.constant 0 : i32
    return %arg0, %c0_i32 : i32, i32
  }
  func.func @transform_1(%arg0: i32) -> (i32, i32) {
    %c0_i32 = arith.constant 0 : i32
    %c0_i32_0 = arith.constant 0 : i32
    %c0_i32_1 = arith.constant 0 : i32
    return %c0_i32, %c0_i32_0 : i32, i32
  }
  func.func @transform_2(%arg0: i32) -> (i32, i32) {
    %c0_i32 = arith.constant 0 : i32
    %c0_i32_0 = arith.constant 0 : i32
    %c0_i32_1 = arith.constant 0 : i32
    return %c0_i32, %c0_i32_0 : i32, i32
  }
  func.func @transform_3(%arg0: i32) -> (i32, i32) {
    %c0_i32 = arith.constant 0 : i32
    %c0_i32_0 = arith.constant 0 : i32
    return %arg0, %c0_i32 : i32, i32
  }
}

</mosaic_0001>

<bundles_post_ra>
// kernel: fully_connected.1
= control target key start
LH: loop header
LB: loop body
LE: loop exit
PB: predicated region body
PF: predicated region fallthrough
CT: control target
= control target key end

     0   :  { %8 = vsyncpa [#allocation3], 0  ;;  %v169_v2 = vmov 0.0|0.0   ;;  %vm29_vm0 = vcmask 1046528   ;;  %vm170_vm1 = vmmov 1   ;;  %vm171_vm3 = vmmov 0   ;;  %s220_s0 = inlined_call_operand.vmem [shape: f32[2,15], index: 0, kind: input, shape index: {}]   ;;  %s221_s1 = inlined_call_operand.vmem [shape: f32[15,10], index: 1, kind: input, shape index: {}]   ;;  %s222_s2 = inlined_call_operand.vmem [shape: f32[1,10], index: 2, kind: input, shape index: {}]   ;;  %s223_s3 = inlined_call_operand.hbm [shape: f32[2,10], index: 3, kind: output, shape index: {}]  }
   0x1   :  { %v16_v0 = vld [vmem:[%s221_s1] sm:$0xff]  ;;  %v17_v1 = vld [vmem:[%s221_s1 + $0x8] sm:$0x7f]  ;;  %134 = vmatprep.subr.bf16.mxu0 %v169_v2  ;;  %vm136_vm2 = vmpackc.low %vm29_vm0, %vm170_vm1  ;;  %v172_v4 = vmov 0.0   ;;  %vm25_vm4 = vcmask 121856   ;;  %vm103_vm5 = vcmask 80896  }
   0x2   :  { %v135_v3 = vpack.c.bf16 %v17_v1, %v16_v0  ;;  %131 = vmatprep.mubr.msk.f32.mxu0 %vm171_vm3, %v172_v4  ;;  %v15_v5 = vld [vmem:[%s220_s0] sm:$0xff] }
   0x3   :  { %v121_v6 = vld [vmem:[%s222_s2] ss:$0 sm:$0xff] }
   0x4   :  { %137 = vmatpush3.bf16.msk.msra.mxu0 %vm136_vm2, %v135_v3 }
   0x7   :  { %132 = vmatmul.mubr.msk.f32.vlgmr.msra.gmra.mrb[0].mxu0 %vm25_vm4, %v15_v5 }
  0xda   :  { %v99_v7 = vpop.f32.mrb[0].mxu0 }
  0xdb   :  { %v100_v8 = vadd.f32 %v121_v6, %v99_v7  ;;  %v133_v9 = vpop.f32.mrb[1].mxu0 }
  0xdd   :  { %104 = vst.msk [vmem:[#allocation2] sm:$0xff] %vm103_vm5, %v100_v8 }
  0xde   :  { %109 = vsyncadd [#allocation3], 96  ;;  %s173_s1 = smov [#allocation2]  }
  0xdf   :  { %s110_s20 = sshll.u32 %s173_s1, 4  ;;  %s111_s20 = int_to_ptr.vmem [resolvable:$true] %s110_s20 }
  0xe0   :  { %s145_s21 = scalar_lea.vmem %s111_s20, 32  ;;  %s149_s22 = scalar_lea.vmem %s111_s20, 128 }
  0xe1   :  { %p146_p0 = scmp.ne.s32.totalorder %s111_s20, %s145_s21  ;;  %p150_p1 = scmp.lt.s32.totalorder %s111_s20, %s111_s20 }
  0xe2   :  { %p151_p2 = scmp.lt.s32.totalorder %s149_s22, %s145_s21 }
  0xe4   :  { %p152_p3 = por %p151_p2, %p150_p1 }
  0xe6   :  { %p153_p4 = pnand %p152_p3, %p146_p0 }
  0xe8   :  { %156 = shalt.err (!%p153_p4)
}
  0xe9   :  { %s157_s2 = scalar_lea.hbm %s223_s3, 32 }
  0xea   :  { %p158_p5 = scmp.ne.s32.totalorder %s223_s3, %s157_s2  ;;  %p161_p6 = scmp.lt.u32.totalorder %s157_s2, %s223_s3 }
  0xec   :  { %p163_p7 = pnand %p161_p6, %p158_p5 }
  0xee   :  { %166 = shalt.err (!%p163_p7)
}
  0xef   :  { %s174_s28 = smov 32   ;;  %s175_s29 = smov 2  }
  0xf0   :  { %116 = dma.vmem_to_hbm [thread:$0]  %s111_s20, 32, %s223_s3, [#allocation3], %s174_s28, %s174_s28, %s175_s29  }
  0xf1   :  { %167 = dma.done.wait [#allocation3], 128  }
  0xf2   :  { %168 = vsyncadd [#allocation3], 4294967168 }
  0xf3   :  { %120 = vsyncpa [#allocation3], 1 }

</bundles_post_ra>
